<compile_context>
chip_gen: v7x
topology: tpu7x:2x2x1
jax: 0.10.0
libtpu: 0.0.40
codegen_flags: <defaults>
</compile_context>

<pallas_src>
import jax
import jax.numpy as jnp
from jax.experimental import pallas as pl
from jax.experimental.pallas import tpu as pltpu


def coattention_kernel(sent_ref, table_ref, sm_col_ref, tm_col_ref,
                       sm_row_ref, tm_row_ref,
                       wa_ref, ws_ref, wt_ref, ws2_ref, wt2_ref,
                       p_sent_ref, p_table_ref):
    f32 = jnp.float32
    s = sent_ref[...]                          # (bb, Ls, H) compute dtype (cdt)
    t = table_ref[...]                         # (bb, Lt, H) cdt
    cdt = s.dtype

    bb, Ls, H = s.shape
    Lt = t.shape[1]

    sm_col = sm_col_ref[...]                   # (bb, Ls, 1) cdt in {0, 1}
    tm_col = tm_col_ref[...]                   # (bb, Lt, 1) cdt in {0, 1}

    wa = wa_ref[...]                           # (H, H) cdt (pre-cast in wrapper)
    ws = ws_ref[...]                           # (H, H) cdt
    wt = wt_ref[...]                           # (H, H) cdt
    ws2 = ws2_ref[...]                         # (1, H) f32 scoring row
    wt2 = wt2_ref[...]                         # (1, H) f32 scoring row

    # ---- stage 1: fused (bb*L, H) @ (H, H) projections (f32 accumulation) ----
    s_flat = s.reshape(bb * Ls, H)
    t_flat = t.reshape(bb * Lt, H)
    s_lin = jnp.dot(s_flat, ws, preferred_element_type=f32).reshape(bb, Ls, H)
    t_lin = jnp.dot(t_flat, wt, preferred_element_type=f32).reshape(bb, Lt, H)

    # Rank-1 mask folded into the affinity operands: mask[b,i,j] = sm_i * tm_j,
    # and the per-row table mask commutes with the Wa projection.
    s_m = s * sm_col                                           # (bb, Ls, H) cdt
    t_m = (t * tm_col).reshape(bb * Lt, H)                     # (bb*Lt, H) cdt
    ta_m = jnp.dot(t_m, wa).reshape(bb, Lt, H)                 # (bb, Lt, H) cdt

    # ---- masked affinity and its transpose, both straight off the MXU ----
    aff = jnp.einsum('bih,bjh->bij', s_m, ta_m,
                     preferred_element_type=f32)               # (bb, Ls, Lt)
    aff_t = jnp.einsum('bjh,bih->bji', ta_m, s_m,
                       preferred_element_type=f32)             # (bb, Lt, Ls)

    # ---- stage 2: kept in f32 (no duplicate low-precision affinity copy) ----
    h_sent = jnp.tanh(
        s_lin + jnp.einsum('bij,bjh->bih', aff, t_lin,
                           preferred_element_type=f32))        # (bb, Ls, H)
    h_table = jnp.tanh(
        t_lin + jnp.einsum('bji,bih->bjh', aff_t, s_lin,
                           preferred_element_type=f32))        # (bb, Lt, H)

    # ---- scoring: VPU multiply + lane reduce (no N=1 MXU matmul) ----
    hs = jnp.sum(h_sent * ws2, axis=-1)[:, None, :]            # (bb, 1, Ls) f32
    ht = jnp.sum(h_table * wt2, axis=-1)[:, None, :]           # (bb, 1, Lt) f32

    neg_inf = jnp.float32(-jnp.inf)
    hs = jnp.where(sm_row_ref[...] < 0.5, neg_inf, hs)
    ht = jnp.where(tm_row_ref[...] < 0.5, neg_inf, ht)

    # Softmax over the sequence axis (torch dim=-2) == the lane axis here.
    # A fully-masked row yields NaN, identical to the torch module.
    def softmax_lane(x):
        m = jnp.max(x, axis=-1, keepdims=True)
        e = jnp.exp(x - m)
        denom = jnp.sum(e, axis=-1, keepdims=True)
        return e * pl.reciprocal(denom, approx=False)

    p_sent_ref[...] = softmax_lane(hs)
    p_table_ref[...] = softmax_lane(ht)


def _round_up(x, m):
    return (x + m - 1) // m * m


def _estimate_block_vmem(bb, Ls, Lt, H, emb_bytes):
    """Rough per-grid-step live-set estimate (bytes) for block_b selection."""
    per_b = (2 * (Ls + Lt) * H * emb_bytes        # double-buffered embedding inputs
             + 5 * (Ls + Lt) * H * 4              # f32 projections / hidden states
             + (Ls + Lt) * H * emb_bytes          # masked operands s_m / ta_m
             + 2 * Ls * Lt * 4                    # aff + aff^T (f32)
             + 4 * (Ls + Lt) * (emb_bytes + 4))   # masks + double-buffered outputs
    weights = 3 * H * H * emb_bytes + 2 * H * 4
    return bb * per_b + 2 * weights


def _pick_block_b(B, Ls, Lt, H, emb_bytes, budget):
    divisors = [d for d in range(1, B + 1) if B % d == 0]
    # Prefer >= 2 grid steps so both v7x TensorCores get work and the pipeline
    # can overlap DMA with compute; fall back to grid=1 only when B == 1.
    cands = [d for d in divisors if B // d >= 2] or divisors
    best = cands[0]
    for d in cands:
        if _estimate_block_vmem(d, Ls, Lt, H, emb_bytes) <= budget:
            best = d
    return best


def coattention(sent_emb, table_emb, sent_mask, table_mask, params, *,
                block_b=None):
    """params = (Wa_T, Ws_T, Wt_T, Ws2_T, Wt2_T); every W stored as (in, out)."""
    B, Ls, H = sent_emb.shape
    _, Lt, _ = table_emb.shape
    wa_t, ws_t, wt_t, ws2_t, wt2_t = params

    cdt = sent_emb.dtype
    assert table_emb.dtype == cdt
    emb_bytes = jnp.dtype(cdt).itemsize
    sub = 8 if emb_bytes >= 4 else 32 // emb_bytes   # sublane tile: f32 -> 8, bf16 -> 16

    # ---- pad sequence lengths to the sublane tile (relayout-free reshapes) ----
    Ls_p, Lt_p = _round_up(Ls, sub), _round_up(Lt, sub)
    if Ls_p != Ls:
        sent_emb = jnp.pad(sent_emb, ((0, 0), (0, Ls_p - Ls), (0, 0)))
        sent_mask = jnp.pad(sent_mask, ((0, 0), (0, Ls_p - Ls)))
    if Lt_p != Lt:
        table_emb = jnp.pad(table_emb, ((0, 0), (0, Lt_p - Lt), (0, 0)))
        table_mask = jnp.pad(table_mask, ((0, 0), (0, Lt_p - Lt)))

    # ---- weights: pre-cast matmul weights to the compute dtype; scores in f32 ----
    wa = wa_t.astype(cdt)
    ws = ws_t.astype(cdt)
    wt = wt_t.astype(cdt)
    ws2_row = ws2_t.reshape(1, H).astype(jnp.float32)
    wt2_row = wt2_t.reshape(1, H).astype(jnp.float32)

    # ---- masks: column layout (fold into operands) + row layout (-inf fill) ----
    sm_col = sent_mask.astype(cdt)[..., None]                 # (B, Ls_p, 1)
    tm_col = table_mask.astype(cdt)[..., None]                # (B, Lt_p, 1)
    sm_row = sent_mask.astype(jnp.float32)[:, None, :]        # (B, 1, Ls_p)
    tm_row = table_mask.astype(jnp.float32)[:, None, :]       # (B, 1, Lt_p)

    # ---- per-generation VMEM budget and batch-block selection ----
    try:
        info = pltpu.get_tpu_info()
        phys_vmem = getattr(info, "vmem_capacity_bytes", 64 * 1024 * 1024)
    except Exception:
        phys_vmem = 64 * 1024 * 1024                          # conservative (v7x)
    vmem_limit = min(int(phys_vmem * 3 // 4), 100 * 1024 * 1024)

    if block_b is None:
        bb = _pick_block_b(B, Ls_p, Lt_p, H, emb_bytes, int(vmem_limit * 0.6))
    else:
        assert B % block_b == 0, "block_b must divide B"
        bb = block_b
    grid = (B // bb,)

    emb_spec = lambda L: pl.BlockSpec((bb, L, H), lambda b: (b, 0, 0))
    col_spec = lambda L: pl.BlockSpec((bb, L, 1), lambda b: (b, 0, 0))
    row_spec = lambda L: pl.BlockSpec((bb, 1, L), lambda b: (b, 0, 0))
    w_spec = lambda r, c: pl.BlockSpec((r, c), lambda b: (0, 0))
    # TODO(synk): on v5e consider pipeline_mode=pl.Buffered(3) on the embedding
    # specs to better hide HBM latency (mem-bound regime at small H).

    p_sent_p, p_table_p = pl.pallas_call(
        coattention_kernel,
        out_shape=(jax.ShapeDtypeStruct((B, 1, Ls_p), jnp.float32),
                   jax.ShapeDtypeStruct((B, 1, Lt_p), jnp.float32)),
        grid=grid,
        in_specs=[emb_spec(Ls_p), emb_spec(Lt_p),
                  col_spec(Ls_p), col_spec(Lt_p),
                  row_spec(Ls_p), row_spec(Lt_p),
                  w_spec(H, H), w_spec(H, H), w_spec(H, H),
                  w_spec(1, H), w_spec(1, H)],
        out_specs=(pl.BlockSpec((bb, 1, Ls_p), lambda b: (b, 0, 0)),
                   pl.BlockSpec((bb, 1, Lt_p), lambda b: (b, 0, 0))),
        compiler_params=pltpu.CompilerParams(
            dimension_semantics=("parallel",),
            vmem_limit_bytes=vmem_limit),
    )(sent_emb, table_emb, sm_col, tm_col, sm_row, tm_row,
      wa, ws, wt, ws2_row, wt2_row)

    # Slice away sequence padding and restore the module's (B, L, 1) layout.
    p_sent = p_sent_p[:, 0, :Ls].astype(cdt)[..., None]
    p_table = p_table_p[:, 0, :Lt].astype(cdt)[..., None]
    return p_sent, p_table


def coattention_reference(sent, table, sent_mask, table_mask, params):
    """Pure-JAX replica of the PyTorch forward for correctness checking."""
    wa_t, ws_t, wt_t, ws2_t, wt2_t = params
    with jax.default_matmul_precision('highest'):
        sent = sent.astype(jnp.float32)
        table = table.astype(jnp.float32)
        smf = sent_mask.astype(jnp.float32)
        tmf = table_mask.astype(jnp.float32)
        mask = smf[..., :, None] * tmf[..., None, :]
        aff = jnp.einsum('bsh,bth->bst', sent, table @ wa_t) * mask
        s_lin = sent @ ws_t
        t_lin = table @ wt_t
        h_sent = jnp.tanh(s_lin + jnp.einsum('bst,bth->bsh', aff, t_lin))
        h_table = jnp.tanh(t_lin + jnp.einsum('bst,bsh->bth', aff, s_lin))
        hs = h_sent @ ws2_t
        ht = h_table @ wt2_t
        hs = jnp.where(smf[..., None] == 0, -jnp.inf, hs)
        ht = jnp.where(tmf[..., None] == 0, -jnp.inf, ht)
        return jax.nn.softmax(hs, axis=-2), jax.nn.softmax(ht, axis=-2)


if __name__ == "__main__":
    B, Ls, Lt, H = 2, 8, 16, 32

    key = jax.random.PRNGKey(0)
    k_s, k_t, k1, k2, k3, k4, k5, k6, k7 = jax.random.split(key, 9)

    sent_emb = jax.random.normal(k_s, (B, Ls, H), dtype=jnp.float32)
    table_emb = jax.random.normal(k_t, (B, Lt, H), dtype=jnp.float32)

    # deterministic masks (at least one valid position per row to avoid NaN softmax)
    sent_mask = jnp.array([[1] * 8,
                           [1] * 5 + [0] * 3], dtype=jnp.int32)
    table_mask = jnp.array([[1] * 16,
                            [1] * 10 + [0] * 6], dtype=jnp.int32)

    scale = 1.0 / jnp.sqrt(jnp.float32(H))
    # nn.Linear weights are (out, in); store transposed (in, out) for x @ W.T
    wa_t = jax.random.normal(k1, (H, H), dtype=jnp.float32) * scale
    ws_t = jax.random.normal(k2, (H, H), dtype=jnp.float32) * scale
    wt_t = jax.random.normal(k3, (H, H), dtype=jnp.float32) * scale
    ws2_t = jax.random.normal(k4, (H, 1), dtype=jnp.float32) * scale
    wt2_t = jax.random.normal(k5, (H, 1), dtype=jnp.float32) * scale
    params = (wa_t, ws_t, wt_t, ws2_t, wt2_t)

    # ---- f32 path: tight check against the pure-JAX reference ----
    p_sent, p_table = coattention(sent_emb, table_emb, sent_mask, table_mask, params)
    jax.block_until_ready((p_sent, p_table))

    r_sent, r_table = coattention_reference(sent_emb, table_emb,
                                            sent_mask, table_mask, params)
    assert p_sent.shape == (B, Ls, 1) and p_table.shape == (B, Lt, 1)
    assert jnp.allclose(p_sent, r_sent, atol=1e-5, rtol=1e-5)
    assert jnp.allclose(p_table, r_table, atol=1e-5, rtol=1e-5)

    # ---- bf16 path: inputs/weights stay bf16 through DMA/MXU, f32 downstream ----
    pb_sent, pb_table = coattention(sent_emb.astype(jnp.bfloat16),
                                    table_emb.astype(jnp.bfloat16),
                                    sent_mask, table_mask, params)
    jax.block_until_ready((pb_sent, pb_table))
    assert jnp.allclose(pb_sent.astype(jnp.float32), r_sent, atol=1e-1)
    assert jnp.allclose(pb_table.astype(jnp.float32), r_table, atol=1e-1)

    # ---- ragged shapes: exercise the sublane padding + output slicing path ----
    Ls2, Lt2 = 7, 13
    s2 = jax.random.normal(k6, (B, Ls2, H), dtype=jnp.float32)
    t2 = jax.random.normal(k7, (B, Lt2, H), dtype=jnp.float32)
    sm2 = jnp.array([[1] * 7, [1] * 4 + [0] * 3], dtype=jnp.int32)
    tm2 = jnp.array([[1] * 13, [1] * 9 + [0] * 4], dtype=jnp.int32)
    p2_s, p2_t = coattention(s2, t2, sm2, tm2, params)
    jax.block_until_ready((p2_s, p2_t))
    r2_s, r2_t = coattention_reference(s2, t2, sm2, tm2, params)
    assert p2_s.shape == (B, Ls2, 1) and p2_t.shape == (B, Lt2, 1)
    assert jnp.allclose(p2_s, r2_s, atol=1e-5, rtol=1e-5)
    assert jnp.allclose(p2_t, r2_t, atol=1e-5, rtol=1e-5)

    print("KERNEL_OK")
</pallas_src>

<mosaic_0001>
module attributes {stable_mosaic.version = 11 : i64} {
  func.func @coattention_kernel(%arg0: i32, %arg1: memref<1x8x32xf32, #tpu.memory_space<vmem>>, %arg2: memref<1x16x32xf32, #tpu.memory_space<vmem>>, %arg3: memref<1x8x1xf32, #tpu.memory_space<vmem>>, %arg4: memref<1x16x1xf32, #tpu.memory_space<vmem>>, %arg5: memref<1x1x8xf32, #tpu.memory_space<vmem>>, %arg6: memref<1x1x16xf32, #tpu.memory_space<vmem>>, %arg7: memref<32x32xf32, #tpu.memory_space<vmem>>, %arg8: memref<32x32xf32, #tpu.memory_space<vmem>>, %arg9: memref<32x32xf32, #tpu.memory_space<vmem>>, %arg10: memref<1x32xf32, #tpu.memory_space<vmem>>, %arg11: memref<1x32xf32, #tpu.memory_space<vmem>>, %arg12: memref<1x1x8xf32, #tpu.memory_space<vmem>>, %arg13: memref<1x1x16xf32, #tpu.memory_space<vmem>>) attributes {dimension_semantics = [#tpu.dimension_semantics<parallel>], iteration_bounds = array<i64: 2>, scalar_prefetch = 0 : i64, scratch_operands = 0 : i64, tpu.core_type = #tpu.core_type<tc>, window_params = [{transform_indices = @transform_0, window_bounds = array<i64: 1, 8, 32>}, {transform_indices = @transform_1, window_bounds = array<i64: 1, 16, 32>}, {transform_indices = @transform_2, window_bounds = array<i64: 1, 8, 1>}, {transform_indices = @transform_3, window_bounds = array<i64: 1, 16, 1>}, {transform_indices = @transform_4, window_bounds = array<i64: 1, 1, 8>}, {transform_indices = @transform_5, window_bounds = array<i64: 1, 1, 16>}, {pipeline_mode = #tpu.pipeline_mode<synchronous>, transform_indices = @transform_6, window_bounds = array<i64: 32, 32>}, {pipeline_mode = #tpu.pipeline_mode<synchronous>, transform_indices = @transform_7, window_bounds = array<i64: 32, 32>}, {pipeline_mode = #tpu.pipeline_mode<synchronous>, transform_indices = @transform_8, window_bounds = array<i64: 32, 32>}, {pipeline_mode = #tpu.pipeline_mode<synchronous>, transform_indices = @transform_9, window_bounds = array<i64: 1, 32>}, {pipeline_mode = #tpu.pipeline_mode<synchronous>, transform_indices = @transform_10, window_bounds = array<i64: 1, 32>}, {transform_indices = @transform_11, window_bounds = array<i64: 1, 1, 8>}, {transform_indices = @transform_12, window_bounds = array<i64: 1, 1, 16>}]} {
    %c0 = arith.constant 0 : index
    %c0_0 = arith.constant 0 : index
    %c0_1 = arith.constant 0 : index
    %0 = vector.load %arg1[%c0, %c0_0, %c0_1] : memref<1x8x32xf32, #tpu.memory_space<vmem>>, vector<1x8x32xf32>
    %c0_2 = arith.constant 0 : index
    %c0_3 = arith.constant 0 : index
    %c0_4 = arith.constant 0 : index
    %1 = vector.load %arg2[%c0_2, %c0_3, %c0_4] : memref<1x16x32xf32, #tpu.memory_space<vmem>>, vector<1x16x32xf32>
    %c0_5 = arith.constant 0 : index
    %c0_6 = arith.constant 0 : index
    %c0_7 = arith.constant 0 : index
    %2 = vector.load %arg3[%c0_5, %c0_6, %c0_7] : memref<1x8x1xf32, #tpu.memory_space<vmem>>, vector<1x8x1xf32>
    %c0_8 = arith.constant 0 : index
    %c0_9 = arith.constant 0 : index
    %c0_10 = arith.constant 0 : index
    %3 = vector.load %arg4[%c0_8, %c0_9, %c0_10] : memref<1x16x1xf32, #tpu.memory_space<vmem>>, vector<1x16x1xf32>
    %c0_11 = arith.constant 0 : index
    %c0_12 = arith.constant 0 : index
    %4 = vector.load %arg7[%c0_11, %c0_12] : memref<32x32xf32, #tpu.memory_space<vmem>>, vector<32x32xf32>
    %c0_13 = arith.constant 0 : index
    %c0_14 = arith.constant 0 : index
    %5 = vector.load %arg8[%c0_13, %c0_14] : memref<32x32xf32, #tpu.memory_space<vmem>>, vector<32x32xf32>
    %c0_15 = arith.constant 0 : index
    %c0_16 = arith.constant 0 : index
    %6 = vector.load %arg9[%c0_15, %c0_16] : memref<32x32xf32, #tpu.memory_space<vmem>>, vector<32x32xf32>
    %c0_17 = arith.constant 0 : index
    %c0_18 = arith.constant 0 : index
    %7 = vector.load %arg10[%c0_17, %c0_18] : memref<1x32xf32, #tpu.memory_space<vmem>>, vector<1x32xf32>
    %c0_19 = arith.constant 0 : index
    %c0_20 = arith.constant 0 : index
    %8 = vector.load %arg11[%c0_19, %c0_20] : memref<1x32xf32, #tpu.memory_space<vmem>>, vector<1x32xf32>
    %9 = vector.shape_cast %0 : vector<1x8x32xf32> to vector<8x32xf32>
    %10 = vector.shape_cast %1 : vector<1x16x32xf32> to vector<16x32xf32>
    %cst = arith.constant dense<0.000000e+00> : vector<8x32xf32>
    %11 = tpu.matmul %9, %5, %cst {dimension_numbers = #tpu.dot_dimension_numbers<[1], [0], [0], [1], [0, 0, 1, 1], [], []>} : vector<8x32xf32>, vector<32x32xf32>, vector<8x32xf32> -> vector<8x32xf32>
    %12 = vector.shape_cast %11 : vector<8x32xf32> to vector<1x8x32xf32>
    %cst_21 = arith.constant dense<0.000000e+00> : vector<16x32xf32>
    %13 = tpu.matmul %10, %6, %cst_21 {dimension_numbers = #tpu.dot_dimension_numbers<[1], [0], [0], [1], [0, 0, 1, 1], [], []>} : vector<16x32xf32>, vector<32x32xf32>, vector<16x32xf32> -> vector<16x32xf32>
    %14 = vector.shape_cast %13 : vector<16x32xf32> to vector<1x16x32xf32>
    %15 = vector.broadcast %2 : vector<1x8x1xf32> to vector<1x8x32xf32>
    %16 = arith.mulf %0, %15 : vector<1x8x32xf32>
    %17 = vector.broadcast %3 : vector<1x16x1xf32> to vector<1x16x32xf32>
    %18 = arith.mulf %1, %17 : vector<1x16x32xf32>
    %19 = vector.shape_cast %18 : vector<1x16x32xf32> to vector<16x32xf32>
    %cst_22 = arith.constant dense<0.000000e+00> : vector<16x32xf32>
    %20 = tpu.matmul %19, %4, %cst_22 {dimension_numbers = #tpu.dot_dimension_numbers<[1], [0], [0], [1], [0, 0, 1, 1], [], []>} : vector<16x32xf32>, vector<32x32xf32>, vector<16x32xf32> -> vector<16x32xf32>
    %21 = vector.shape_cast %20 : vector<16x32xf32> to vector<1x16x32xf32>
    "tpu.trace_start"() <{level = 10 : i32, message = "bih,bjh->bij"}> : () -> ()
    %cst_23 = arith.constant dense<0.000000e+00> : vector<1x8x16xf32>
    %22 = tpu.matmul %16, %21, %cst_23 {dimension_numbers = #tpu.dot_dimension_numbers<[2], [2], [1], [1], [0, 0, 0, 1, 1, 1], [0], [0]>} : vector<1x8x32xf32>, vector<1x16x32xf32>, vector<1x8x16xf32> -> vector<1x8x16xf32>
    "tpu.trace_stop"() : () -> ()
    "tpu.trace_start"() <{level = 10 : i32, message = "bjh,bih->bji"}> : () -> ()
    %cst_24 = arith.constant dense<0.000000e+00> : vector<1x16x8xf32>
    %23 = tpu.matmul %21, %16, %cst_24 {dimension_numbers = #tpu.dot_dimension_numbers<[2], [2], [1], [1], [0, 0, 0, 1, 1, 1], [0], [0]>} : vector<1x16x32xf32>, vector<1x8x32xf32>, vector<1x16x8xf32> -> vector<1x16x8xf32>
    "tpu.trace_stop"() : () -> ()
    "tpu.trace_start"() <{level = 10 : i32, message = "bij,bjh->bih"}> : () -> ()
    %cst_25 = arith.constant dense<0.000000e+00> : vector<1x8x32xf32>
    %24 = tpu.matmul %22, %14, %cst_25 {dimension_numbers = #tpu.dot_dimension_numbers<[2], [1], [1], [2], [0, 0, 0, 1, 1, 2], [0], [0]>} : vector<1x8x16xf32>, vector<1x16x32xf32>, vector<1x8x32xf32> -> vector<1x8x32xf32>
    "tpu.trace_stop"() : () -> ()
    %25 = arith.addf %12, %24 : vector<1x8x32xf32>
    %26 = math.tanh %25 : vector<1x8x32xf32>
    "tpu.trace_start"() <{level = 10 : i32, message = "bji,bih->bjh"}> : () -> ()
    %cst_26 = arith.constant dense<0.000000e+00> : vector<1x16x32xf32>
    %27 = tpu.matmul %23, %12, %cst_26 {dimension_numbers = #tpu.dot_dimension_numbers<[2], [1], [1], [2], [0, 0, 0, 1, 1, 2], [0], [0]>} : vector<1x16x8xf32>, vector<1x8x32xf32>, vector<1x16x32xf32> -> vector<1x16x32xf32>
    "tpu.trace_stop"() : () -> ()
    %28 = arith.addf %14, %27 : vector<1x16x32xf32>
    %29 = math.tanh %28 : vector<1x16x32xf32>
    %30 = vector.shape_cast %7 : vector<1x32xf32> to vector<1x1x32xf32>
    %31 = vector.broadcast %30 : vector<1x1x32xf32> to vector<1x8x32xf32>
    %32 = arith.mulf %26, %31 : vector<1x8x32xf32>
    %cst_27 = arith.constant dense<0.000000e+00> : vector<1x8xf32>
    %33 = vector.multi_reduction <add>, %32, %cst_27 [2] : vector<1x8x32xf32> to vector<1x8xf32>
    %34 = vector.shape_cast %33 : vector<1x8xf32> to vector<1x1x8xf32>
    %35 = vector.shape_cast %8 : vector<1x32xf32> to vector<1x1x32xf32>
    %36 = vector.broadcast %35 : vector<1x1x32xf32> to vector<1x16x32xf32>
    %37 = arith.mulf %29, %36 : vector<1x16x32xf32>
    %cst_28 = arith.constant dense<0.000000e+00> : vector<1x16xf32>
    %38 = vector.multi_reduction <add>, %37, %cst_28 [2] : vector<1x16x32xf32> to vector<1x16xf32>
    %39 = vector.shape_cast %38 : vector<1x16xf32> to vector<1x1x16xf32>
    %c0_29 = arith.constant 0 : index
    %c0_30 = arith.constant 0 : index
    %c0_31 = arith.constant 0 : index
    %40 = vector.load %arg5[%c0_29, %c0_30, %c0_31] : memref<1x1x8xf32, #tpu.memory_space<vmem>>, vector<1x1x8xf32>
    %cst_32 = arith.constant 5.000000e-01 : f32
    %41 = vector.broadcast %cst_32 : f32 to vector<1x1x8xf32>
    %42 = arith.cmpf olt, %40, %41 : vector<1x1x8xf32>
    %cst_33 = arith.constant 0xFF800000 : f32
    %43 = vector.broadcast %cst_33 : f32 to vector<1x1x8xf32>
    %44 = arith.select %42, %43, %34 : vector<1x1x8xi1>, vector<1x1x8xf32>
    %c0_34 = arith.constant 0 : index
    %c0_35 = arith.constant 0 : index
    %c0_36 = arith.constant 0 : index
    %45 = vector.load %arg6[%c0_34, %c0_35, %c0_36] : memref<1x1x16xf32, #tpu.memory_space<vmem>>, vector<1x1x16xf32>
    %cst_37 = arith.constant 5.000000e-01 : f32
    %46 = vector.broadcast %cst_37 : f32 to vector<1x1x16xf32>
    %47 = arith.cmpf olt, %45, %46 : vector<1x1x16xf32>
    %cst_38 = arith.constant 0xFF800000 : f32
    %48 = vector.broadcast %cst_38 : f32 to vector<1x1x16xf32>
    %49 = arith.select %47, %48, %39 : vector<1x1x16xi1>, vector<1x1x16xf32>
    %cst_39 = arith.constant dense<0xFF800000> : vector<1x1xf32>
    %50 = vector.multi_reduction <maximumf>, %44, %cst_39 [2] : vector<1x1x8xf32> to vector<1x1xf32>
    %51 = vector.shape_cast %50 : vector<1x1xf32> to vector<1x1x1xf32>
    %52 = vector.broadcast %51 : vector<1x1x1xf32> to vector<1x1x8xf32>
    %53 = arith.subf %44, %52 : vector<1x1x8xf32>
    %54 = math.exp %53 : vector<1x1x8xf32>
    %cst_40 = arith.constant dense<0.000000e+00> : vector<1x1xf32>
    %55 = vector.multi_reduction <add>, %54, %cst_40 [2] : vector<1x1x8xf32> to vector<1x1xf32>
    %56 = vector.shape_cast %55 : vector<1x1xf32> to vector<1x1x1xf32>
    %57 = tpu.reciprocal %56 : vector<1x1x1xf32> -> vector<1x1x1xf32>
    %58 = vector.broadcast %57 : vector<1x1x1xf32> to vector<1x1x8xf32>
    %59 = arith.mulf %54, %58 : vector<1x1x8xf32>
    %c0_41 = arith.constant 0 : index
    %c0_42 = arith.constant 0 : index
    %c0_43 = arith.constant 0 : index
    %60 = vector.load %arg12[%c0_41, %c0_42, %c0_43] : memref<1x1x8xf32, #tpu.memory_space<vmem>>, vector<1x1x8xf32>
    tpu.vector_store %arg12[%c0_41, %c0_42, %c0_43], %59 {strides = array<i32>} : memref<1x1x8xf32, #tpu.memory_space<vmem>>, vector<1x1x8xf32>,
    %cst_44 = arith.constant dense<0xFF800000> : vector<1x1xf32>
    %61 = vector.multi_reduction <maximumf>, %49, %cst_44 [2] : vector<1x1x16xf32> to vector<1x1xf32>
    %62 = vector.shape_cast %61 : vector<1x1xf32> to vector<1x1x1xf32>
    %63 = vector.broadcast %62 : vector<1x1x1xf32> to vector<1x1x16xf32>
    %64 = arith.subf %49, %63 : vector<1x1x16xf32>
    %65 = math.exp %64 : vector<1x1x16xf32>
    %cst_45 = arith.constant dense<0.000000e+00> : vector<1x1xf32>
    %66 = vector.multi_reduction <add>, %65, %cst_45 [2] : vector<1x1x16xf32> to vector<1x1xf32>
    %67 = vector.shape_cast %66 : vector<1x1xf32> to vector<1x1x1xf32>
    %68 = tpu.reciprocal %67 : vector<1x1x1xf32> -> vector<1x1x1xf32>
    %69 = vector.broadcast %68 : vector<1x1x1xf32> to vector<1x1x16xf32>
    %70 = arith.mulf %65, %69 : vector<1x1x16xf32>
    %c0_46 = arith.constant 0 : index
    %c0_47 = arith.constant 0 : index
    %c0_48 = arith.constant 0 : index
    %71 = vector.load %arg13[%c0_46, %c0_47, %c0_48] : memref<1x1x16xf32, #tpu.memory_space<vmem>>, vector<1x1x16xf32>
    tpu.vector_store %arg13[%c0_46, %c0_47, %c0_48], %70 {strides = array<i32>} : memref<1x1x16xf32, #tpu.memory_space<vmem>>, vector<1x1x16xf32>,
    return
  }
  func.func @transform_0(%arg0: i32) -> (i32, i32, i32) {
    %c0_i32 = arith.constant 0 : i32
    %c0_i32_0 = arith.constant 0 : i32
    %c0_i32_1 = arith.constant 0 : i32
    return %arg0, %c0_i32, %c0_i32_0 : i32, i32, i32
  }
  func.func @transform_1(%arg0: i32) -> (i32, i32, i32) {
    %c0_i32 = arith.constant 0 : i32
    %c0_i32_0 = arith.constant 0 : i32
    %c0_i32_1 = arith.constant 0 : i32
    return %arg0, %c0_i32, %c0_i32_0 : i32, i32, i32
  }
  func.func @transform_2(%arg0: i32) -> (i32, i32, i32) {
    %c0_i32 = arith.constant 0 : i32
    %c0_i32_0 = arith.constant 0 : i32
    %c0_i32_1 = arith.constant 0 : i32
    return %arg0, %c0_i32, %c0_i32_0 : i32, i32, i32
  }
  func.func @transform_3(%arg0: i32) -> (i32, i32, i32) {
    %c0_i32 = arith.constant 0 : i32
    %c0_i32_0 = arith.constant 0 : i32
    %c0_i32_1 = arith.constant 0 : i32
    return %arg0, %c0_i32, %c0_i32_0 : i32, i32, i32
  }
  func.func @transform_4(%arg0: i32) -> (i32, i32, i32) {
    %c0_i32 = arith.constant 0 : i32
    %c0_i32_0 = arith.constant 0 : i32
    %c0_i32_1 = arith.constant 0 : i32
    return %arg0, %c0_i32, %c0_i32_0 : i32, i32, i32
  }
  func.func @transform_5(%arg0: i32) -> (i32, i32, i32) {
    %c0_i32 = arith.constant 0 : i32
    %c0_i32_0 = arith.constant 0 : i32
    %c0_i32_1 = arith.constant 0 : i32
    return %arg0, %c0_i32, %c0_i32_0 : i32, i32, i32
  }
  func.func @transform_6(%arg0: i32) -> (i32, i32) {
    %c0_i32 = arith.constant 0 : i32
    %c0_i32_0 = arith.constant 0 : i32
    %c0_i32_1 = arith.constant 0 : i32
    return %c0_i32, %c0_i32_0 : i32, i32
  }
  func.func @transform_7(%arg0: i32) -> (i32, i32) {
    %c0_i32 = arith.constant 0 : i32
    %c0_i32_0 = arith.constant 0 : i32
    %c0_i32_1 = arith.constant 0 : i32
    return %c0_i32, %c0_i32_0 : i32, i32
  }
  func.func @transform_8(%arg0: i32) -> (i32, i32) {
    %c0_i32 = arith.constant 0 : i32
    %c0_i32_0 = arith.constant 0 : i32
    %c0_i32_1 = arith.constant 0 : i32
    return %c0_i32, %c0_i32_0 : i32, i32
  }
  func.func @transform_9(%arg0: i32) -> (i32, i32) {
    %c0_i32 = arith.constant 0 : i32
    %c0_i32_0 = arith.constant 0 : i32
    %c0_i32_1 = arith.constant 0 : i32
    return %c0_i32, %c0_i32_0 : i32, i32
  }
  func.func @transform_10(%arg0: i32) -> (i32, i32) {
    %c0_i32 = arith.constant 0 : i32
    %c0_i32_0 = arith.constant 0 : i32
    %c0_i32_1 = arith.constant 0 : i32
    return %c0_i32, %c0_i32_0 : i32, i32
  }
  func.func @transform_11(%arg0: i32) -> (i32, i32, i32) {
    %c0_i32 = arith.constant 0 : i32
    %c0_i32_0 = arith.constant 0 : i32
    %c0_i32_1 = arith.constant 0 : i32
    return %arg0, %c0_i32, %c0_i32_0 : i32, i32, i32
  }
  func.func @transform_12(%arg0: i32) -> (i32, i32, i32) {
    %c0_i32 = arith.constant 0 : i32
    %c0_i32_0 = arith.constant 0 : i32
    %c0_i32_1 = arith.constant 0 : i32
    return %arg0, %c0_i32, %c0_i32_0 : i32, i32, i32
  }
}

</mosaic_0001>

<bundles_post_ra>
// kernel: tpu_custom_call.1
= control target key start
LH: loop header
LB: loop body
LE: loop exit
PB: predicated region body
PF: predicated region fallthrough
CT: control target
= control target key end

     0   :  { %s2601_s0 = inlined_call_operand.hbm [shape: f32[2,8,32], index: 0, kind: input, shape index: {}]   ;;  %s2602_s1 = inlined_call_operand.vmem [shape: f32[2,16,32], index: 1, kind: input, shape index: {}]   ;;  %s2603_s2 = inlined_call_operand.vmem [shape: f32[2,8,1], index: 2, kind: input, shape index: {}]   ;;  %s2604_s3 = inlined_call_operand.vmem [shape: f32[2,16,1], index: 3, kind: input, shape index: {}]   ;;  %s2605_s4 = inlined_call_operand.vmem [shape: f32[2,1,8], index: 4, kind: input, shape index: {}]   ;;  %s2606_s5 = inlined_call_operand.vmem [shape: f32[2,1,16], index: 5, kind: input, shape index: {}]   ;;  %s2607_s6 = inlined_call_operand.vmem [shape: f32[32,32], index: 6, kind: input, shape index: {}]   ;;  %s2608_s7 = inlined_call_operand.hbm [shape: f32[32,32], index: 7, kind: input, shape index: {}]   ;;  %s2609_s8 = inlined_call_operand.hbm [shape: f32[32,32], index: 8, kind: input, shape index: {}]   ;;  %s2610_s9 = inlined_call_operand.vmem [shape: f32[1,32], index: 9, kind: input, shape index: {}]   ;;  %s2611_s10 = inlined_call_operand.vmem [shape: f32[1,32], index: 10, kind: input, shape index: {}]   ;;  %s2612_s11 = inlined_call_operand.hbm [shape: f32[2,1,8], index: 11, kind: output, shape index: {0}]   ;;  %s2613_s12 = inlined_call_operand.hbm [shape: f32[2,1,16], index: 12, kind: output, shape index: {1}]  }
   0x1   :  { %2623 = sst [smem:[#allocation17_spill]] %s2601_s0 }
   0x2   :  { %2624 = sst [smem:[#allocation18_spill]] %s2612_s11 }
   0x3   :  { %2625 = sst [smem:[#allocation19_spill]] %s2613_s12 }
   0x4   :  { %18 = vsyncpa [#allocation3], 0 }
   0x5   :  { %20 = vsyncpa [#allocation3 + $0x1], 0 }
   0x6   :  { %21 = vsyncpa [#allocation6], 0 }
   0x7   :  { %22 = vsyncpa [#allocation4], 0 }
   0x8   :  { %24 = vsyncpa [#allocation4 + $0x1], 0 }
   0x9   :  { %25 = vsyncpa [#allocation10], 0 }
   0xa   :  { %27 = vsyncpa [#allocation10 + $0x1], 0  ;;  %s2212_s21 = smov 0   ;;  %s2214_s22 = smov 0  }
   0xb   :  { %s2216_s23 = smov 0   ;;  %s2218_s24 = smov 0  }
   0xc LB: > { %2626 = sst [smem:[#allocation15_spill]] %s2121_s21  ;;  %s2233_s25 = sadd.s32 4294967295, %s2133_s24   ;;  %s2133_s24 = sphi %s2218_s24, %s2652_s24   ;;  %s2129_s23 = sphi %s2216_s23, %s2651_s23   ;;  %s2125_s22 = sphi %s2214_s22, %s2650_s22   ;;  %s2121_s21 = sphi %s2212_s21, %s2649_s21  }
   0xd   : > { %s1697_s26 = sadd.s32 4294967294, %s2133_s24   ;;  %p53_p0 = scmp.ne.s32.totalorder %s2125_s22, %s2121_s21 }
   0xe   : > { %p2615_p1 = scmp.eq.s32.totalorder %s2233_s25, 0  ;;  %p318_p3 = scmp.eq.s32.totalorder %s1697_s26, 1 }
   0xf   : > { %p1698_p5 = scmp.ge.s32.totalorder %s2133_s24, 1  ;;  %p351_p7 = scmp.lt.s32.totalorder %s2133_s24, 3 }
  0x10   : > { %p2242_p4 = por %p2615_p1, %p53_p0  ;;  %p2247_p6 = por %p318_p3, %p53_p0 }
  0x11   : > { %p2252_p8 = pnand %p1698_p5, %p351_p7  ;;  %s2135_s30 = smov [#allocation5]  }
  0x12   : > { %s2627_s27 = scalar_select %p2242_p4, 1, 0 }
  0x13   : > { %s2628_s28 = scalar_select %p2247_p6, 1, 0 }
  0x14   : > { %s366_s13 = sshll.u32 %s2135_s30, 4  ;;  %p1864_p9 = pneg %p2252_p8  ;;  %s2256_s13 = int_to_ptr.vmem [resolvable:$true] %s366_s13 }
  0x15   : > { %2629 = sst [smem:[#allocation16_spill]] %s2628_s28  ;;  %s2136_s15 = smov [#allocation7]  }
  0x16   : > { %p2263_p11 = pnand %p1864_p9, %p2615_p1  ;;  %s379_s16 = sshll.u32 %s2136_s15, 4  ;;  %s2267_s16 = int_to_ptr.vmem [resolvable:$true] %s379_s16 }
  0x17   : > { %s1945_s19 = scalar_lea.hbm %s2608_s7, 512 }
  0x18   : > { %p1946_p12 = scmp.ne.s32.totalorder %s2608_s7, %s1945_s19  ;;  %p1947_p13 = pneg %p2263_p11 }
  0x19   : > { %p1952_p5 = scmp.lt.u32.totalorder %s1945_s19, %s2608_s7 }
  0x1a   : > { %p1948_p0 = pnand %p1947_p13, %p1946_p12 }
  0x1c   : > { %p1949_p3 = pneg %p1948_p0 }
  0x1e   : > { %p1954_p7 = pnand %p1952_p5, %p1949_p3 }
  0x20   : > { %1957 = shalt.err (!%p1954_p7)
}
  0x21   : > { %s1958_s15 = scalar_lea.vmem %s2256_s13, 512  ;;  %p1966_p2 = scmp.lt.s32.totalorder %s2256_s13, %s2256_s13 }
  0x22   : > { %p1959_p9 = scmp.ne.s32.totalorder %s2256_s13, %s1958_s15  ;;  %p1967_p12 = scmp.lt.s32.totalorder %s1958_s15, %s1958_s15 }
  0x24   : > { %p1961_p10 = pnand %p1959_p9, %p1947_p13  ;;  %p1968_p0 = por %p1967_p12, %p1966_p2 }
  0x26   : > { %p1962_p1 = pneg %p1961_p10 }
  0x28   : > { %p1969_p6 = pnand %p1968_p0, %p1962_p1 }
  0x2a   : > { %1972 = shalt.err (!%p1969_p6)
}
  0x2b   : > { %s2137_s28 = smov 128   ;;  %s2138_s17 = smov 8  }
  0x2c   : > { %1867 = dma.hbm_to_vmem [thread:$0]  (!%p2263_p11), %s2608_s7, 512, %s2256_s13, [#allocation6], %s2137_s28, %s2137_s28, %s2138_s17  }
  0x2d   : > { %s1973_s30 = scalar_lea.hbm %s2609_s8, 512 }
  0x2e   : > { %p1974_p2 = scmp.ne.s32.totalorder %s2609_s8, %s1973_s30  ;;  %p1980_p10 = scmp.lt.u32.totalorder %s1973_s30, %s2609_s8 }
  0x30   : > { %p1976_p1 = pnand %p1974_p2, %p1947_p13 }
  0x32   : > { %p1977_p6 = pneg %p1976_p1 }
  0x34   : > { %p1982_p3 = pnand %p1980_p10, %p1977_p6 }
  0x36   : > { %1985 = shalt.err (!%p1982_p3)
}
  0x37   : > { %s1986_s13 = scalar_lea.vmem %s2267_s16, 512  ;;  %p1994_p12 = scmp.lt.s32.totalorder %s2267_s16, %s2267_s16 }
  0x38   : > { %p1987_p5 = scmp.ne.s32.totalorder %s2267_s16, %s1986_s13  ;;  %p1995_p0 = scmp.lt.s32.totalorder %s1986_s13, %s1986_s13 }
  0x3a   : > { %p1989_p7 = pnand %p1987_p5, %p1947_p13  ;;  %p1996_p2 = por %p1995_p0, %p1994_p12 }
  0x3c   : > { %p1990_p9 = pneg %p1989_p7 }
  0x3e   : > { %p1997_p1 = pnand %p1996_p2, %p1990_p9 }
  0x40   : > { %2000 = shalt.err (!%p1997_p1)
}
  0x41   : > { %1870 = dma.hbm_to_vmem [thread:$0]  (!%p2263_p11), %s2609_s8, 512, %s2267_s16, [#allocation6], %s2137_s28, %s2137_s28, %s2138_s17  }
  0x42   : > { %s2322_s21 = sadd.s32 1, %s2133_s24   ;;  %s40_s14 = sadd.s32 1, %s2129_s23 }
  0x43   : > { %s37_s18 = ssub.s32 %s2133_s24, %s2322_s21  ;;  %p47_p13 = scmp.ne.s32.totalorder %s2129_s23, %s2125_s22 }
  0x44   : > { %p38_p6 = scmp.eq.s32.totalorder %s37_s18, 0  ;;  %p48_p10 = scmp.eq.s32.totalorder %s2133_s24, 0 }
  0x45   : > { %p2632_p3 = scmp.eq.s32.totalorder %s2233_s25, 1  ;;  %p1884_p7 = scmp.lt.s32.totalorder %s2133_s24, 2 }
  0x46   : > { %s2338_s20 = scalar_select %p38_p6, %s2129_s23, %s40_s14  }
  0x47   : > { %p2332_p5 = por %p2632_p3, %p47_p13  ;;  %p49_p9 = por %p48_p10, %p47_p13 }
  0x48   : > { %s399_s26 = sand.u32 1, %s2129_s23   ;;  %s1703_s16 = sshll.u32 %s2133_s24, 7 }
  0x49   : > { %s2633_s19 = scalar_select %p2332_p5, 1, 0 }
  0x4a   : > { %s1702_s30 = sshll.u32 %s399_s26, 3  ;;  %s2634_s0 = sld [smem:[#allocation17_spill]] }
  0x4b   : > { %s403_s13 = scalar_lea.vmem [#allocation2], %s1702_s30  ;;  %p2349_p11 = pnand %p1884_p7, %p49_p9 }
  0x4c   : > { %s410_s11 = sshll.u32 %s403_s13, 4  ;;  %s400_s14 = scalar_lea.sflag [#allocation3], %s399_s26  ;;  %s2347_s11 = int_to_ptr.vmem [resolvable:$true] %s410_s11 }
  0x4d   : > { %p2003_p0 = pneg %p2349_p11 }
  0x50   : > { %s2345_s15 = scalar_lea.hbm %s2634_s0, %s1703_s16  ;;  %s2006_s28 = scalar_lea.hbm %s2634_s0, 256 }
  0x51   : > { %s2001_s18 = scalar_lea.hbm %s2345_s15, 128  ;;  %p2007_p13 = scmp.lt.u32.totalorder %s2345_s15, %s2634_s0 }
  0x52   : > { %p2002_p12 = scmp.ne.s32.totalorder %s2345_s15, %s2001_s18  ;;  %p2008_p6 = scmp.lt.u32.totalorder %s2006_s28, %s2001_s18 }
  0x53   : > { %p2010_p3 = scmp.lt.u32.totalorder %s2001_s18, %s2345_s15 }
  0x54   : > { %p2004_p2 = pnand %p2003_p0, %p2002_p12  ;;  %p2009_p10 = por %p2008_p6, %p2007_p13 }
  0x56   : > { %p2005_p1 = pneg %p2004_p2  ;;  %p2011_p7 = por %p2010_p3, %p2009_p10 }
  0x58   : > { %p2012_p9 = pnand %p2011_p7, %p2005_p1 }
  0x5a   : > { %2015 = shalt.err (!%p2012_p9)
}
  0x5b   : > { %s2016_s26 = scalar_lea.vmem %s2347_s11, 128  ;;  %s2139_s16 = smov [#allocation2]  }
  0x5c   : > { %p2017_p12 = scmp.ne.s32.totalorder %s2347_s11, %s2016_s26  ;;  %s2021_s30 = sshll.u32 %s2139_s16, 4  ;;  %s2022_s30 = int_to_ptr.vmem [resolvable:$false] %s2021_s30 }
  0x5d   : > { %s2023_s17 = scalar_lea.vmem %s2022_s30, 256  ;;  %p2024_p4 = scmp.lt.s32.totalorder %s2347_s11, %s2022_s30 }
  0x5e   : > { %p2019_p2 = pnand %p2017_p12, %p2003_p0  ;;  %p2025_p13 = scmp.lt.s32.totalorder %s2023_s17, %s2016_s26 }
  0x60   : > { %p2020_p5 = pneg %p2019_p2  ;;  %p2026_p6 = por %p2025_p13, %p2024_p4 }
  0x62   : > { %p2027_p10 = pnand %p2026_p6, %p2020_p5 }
  0x64   : > { %2030 = shalt.err (!%p2027_p10)
}
  0x65   : > { %1874 = dma.hbm_to_vmem [thread:$0]  (!%p2349_p11), %s2345_s15, 128, %s2347_s11, %s400_s14  }
  0x66   : > { %454 = sbr.rel (%p2252_p8) target bundleno = 1557 (0x615), region = 64  ;;  %s2381_s18 = sand.u32 (!%p2252_p8), 1, %s2125_s22  }
  0x67   : > { %s1705_s28 = sshll.u32 (!%p2252_p8), %s2381_s18, 3  ;;  %s457_s13 = scalar_lea.sflag (!%p2252_p8), [#allocation3], %s2381_s18 }
  0x68   : > { %s2385_s26 = scalar_lea.vmem (!%p2252_p8), [#allocation2], %s1705_s28  ;;  %p2636_p4 = scmp.ne.s32.totalorder (!%p2252_p8), %s2627_s27, 0 }
  0x6d   : > { %2104 = dma.done.wait (%p2636_p4), %s457_s13, 128  }
  0x6e   : > { %2106 = vsyncadd (%p2636_p4), %s457_s13, 4294967168  ;;  %p2637_p5 = scmp.eq.s32.totalorder %s2233_s25, 0 }
  0x70   : > { %2108 = dma.done.wait (%p2637_p5), [#allocation6], 1024   ;;  %p2638_p8 = pmov %p2637_p5 }
  0x71   : > { %p532_p11 = scmp.lt.s32.totalorder %s2233_s25, 1  ;;  %v2140_v0 = vmov 0   ;;  %v2141_v1 = vmov 0.0|0.0   ;;  %vm2142_vm0 = vmmov 0   ;;  %v2143_v2 = vmov 0.0   ;;  %v562_v4 = vld [vmem:[#allocation5] sm:$0xff] }
  0x72   : > { %2110 = vsyncadd (%p2638_p8), [#allocation6], 4294966272  ;;  %1929 = vset.pattern.permute.xlu0 %v2140_v0  ;;  %1821 = vmatprep.subr.bf16.mxu0 %v2141_v1  ;;  %v563_v5 = vld [vmem:[#allocation5 + $0x8] sm:$0xff]  ;;  %v564_v6 = vld [vmem:[#allocation5 + $0x10] sm:$0xff]  ;;  %vm572_vm1 = vcmask 261120   ;;  %vm1056_vm3 = vcmask 64512   ;;  %v1169_v63 = vlaneseq }
  0x73   : > { %s2398_s29 = scalar_select %p532_p11, %s2233_s25, 1  ;;  %1772 = vmatprep.mubr.msk.f32.mxu0 %vm2142_vm0, %v2143_v2  ;;  %1930 = vset.pattern.permute.xlu1 %v2140_v0  ;;  %v565_v7 = vld [vmem:[#allocation5 + $0x18] sm:$0xff]  ;;  %v1822_v9 = vpack.c.bf16 %v563_v5, %v562_v4  ;;  %v558_v10 = vld [vmem:[%s2607_s6] sm:$0xff]  ;;  %v560_v15 = vld [vmem:[%s2607_s6 + $0x10] sm:$0xff]  ;;  %vm980_vm4 = vcmask 130048   ;;  %vm1456_vm5 = vcmask 130112  }
  0x74   : > { %v559_v11 = vld [vmem:[%s2607_s6 + $0x8] sm:$0xff]  ;;  %v1825_v13 = vpack.c.bf16 %v565_v7, %v564_v6  ;;  %v561_v16 = vld [vmem:[%s2607_s6 + $0x18] sm:$0xff]  ;;  %v566_v20 = vld [vmem:[#allocation7] sm:$0xff]  ;;  %v2144_v0 = vmov 1966171168   ;;  %vm1487_vm7 = vcmask 122880  }
  0x75   : > { %s1733_s27 = sshll.u32 %s2398_s29, 4  ;;  %1823 = vmatpush3.bf16.msra.mxu0 %v1822_v9  ;;  %v1835_v14 = vpack.c.bf16 %v559_v11, %v558_v10  ;;  %s1710_s16 = sshll.u32 %s2398_s29, 3  ;;  %v552_v17 = vld [vmem:[%s2385_s26] sm:$0xff]  ;;  %v1839_v18 = vpack.c.bf16 %v561_v16, %v560_v15  ;;  %v567_v21 = vld [vmem:[#allocation7 + $0x8] sm:$0xff]  ;;  %vm1845_vm2 = vmpackc.low %vm572_vm1, %vm572_vm1  ;;  %vm1474_vm9 = vcmask 57344  }
  0x76   : > { %s545_s12 = scalar_lea.vmem %s2604_s3, %s1733_s27  ;;  %s2409_s30 = scalar_lea.vmem %s2602_s1, %s1733_s27  ;;  %1824 = vmatprep.subr.bf16.mxu0 %v2141_v1  ;;  %v1827_v22 = vpack.c.bf16 %v567_v21, %v566_v20  ;;  %v568_v23 = vld [vmem:[#allocation7 + $0x10] sm:$0xff]  ;;  %v569_v24 = vld [vmem:[#allocation7 + $0x18] sm:$0xff] }
  0x77   : > { %v556_v3 = vld [vmem:[%s545_s12] sm:$0xff]  ;;  %v557_v8 = vld [vmem:[%s545_s12 + $0x8] sm:$0xff]  ;;  %s540_s13 = scalar_lea.vmem %s2603_s2, %s1710_s16  ;;  %v1831_v25 = vpack.c.bf16 %v569_v24, %v568_v23  ;;  %s551_s14 = scalar_lea.vmem %s2606_s5, %s2398_s29 }
  0x78   : > { %735 = vperm.xlu0 %1929, %v556_v3   ;;  %v553_v12 = vld [vmem:[%s2409_s30] sm:$0xff]  ;;  %1828 = vmatprep.subr.bf16.mxu1 %v1827_v22  ;;  %v554_v26 = vld [vmem:[%s2409_s30 + $0x8] sm:$0xff]  ;;  %s548_s28 = scalar_lea.vmem %s2605_s4, %s2398_s29  ;;  %s2622_s29 = sshll.u32 %s2233_s25, 4 }
  0x79   : > { %1783 = vmatprep.mubr.msk.f32.mxu1 %vm572_vm1, %v553_v12  ;;  %1826 = vmatpush3.bf16.msra.mxu0 %v1825_v13  ;;  %v555_v19 = vld [vmem:[%s540_s13] sm:$0xff]  ;;  %s531_s13 = scalar_lea.vmem [#allocation9], %s2381_s18  ;;  %s2639_s27 = sld [smem:[#allocation19_spill]] }
  0x7a   : > { %1836 = vmatprep.subr.bf16.mxu0 %v1835_v14  ;;  %729 = vperm.xlu1 %1930, %v555_v19   ;;  %v1728_v52 = vld [vmem:[%s2611_s10] ss:$0 sm:$0xff]  ;;  %s1530_s26 = sshll.u32 %s531_s13, 4  ;;  %s2621_s12 = scalar_lea.vmem [#allocation8], %s2381_s18  ;;  %s2518_s26 = int_to_ptr.vmem [resolvable:$true] %s1530_s26 }
  0x7b   : > { %1830 = vmatpush3.bf16.msra.mxu1 %v1827_v22  ;;  %v1727_v59 = vld [vmem:[%s2610_s9] ss:$0 sm:$0xff]  ;;  %s1505_s16 = scalar_lea.sflag [#allocation10], %s2381_s18  ;;  %s2031_s17 = scalar_lea.vmem %s2518_s26, 16 }
  0x7c   : > { %740 = vperm.xlu0 %1929, %v557_v8   ;;  %1773 = vmatmul.mubr.msk.f32.vlgmr.msra.gmra.mrb[0].mxu0 %vm572_vm1, %v552_v17  ;;  %p2032_p0 = scmp.ne.s32.totalorder %s2518_s26, %s2031_s17  ;;  %p2640_p1 = scmp.ne.s32.totalorder %s2633_s19, 0 }
  0x7d   : > { %1838 = vmatpush3.bf16.msra.mxu0 %v1835_v14  ;;  %1832 = vmatprep.subr.bf16.mxu1 %v1831_v25 }
  0x7e   : > { %1840 = vmatprep.subr.bf16.mxu0 %v1839_v18  ;;  %p2033_p3 = pnand %p2032_p0, %p2640_p1 }
  0x7f   : > { %1834 = vmatpush3.bf16.msra.mxu1 %v1831_v25  ;;  %s2516_s11 = scalar_lea.hbm %s2639_s27, %s2622_s29 }
  0x80   : > { %1843 = vmatprep.subr.bf16.mxu1 %v2141_v1  ;;  %p2034_p7 = pneg %p2033_p3 }
  0x81   : > { %1842 = vmatpush3.bf16.msra.mxu0 %v1839_v18 }
  0x82   : > { %1784 = vmatmul.mubr.msk.f32.vlgmr.msra.gmra.mrb[0].mxu1 %vm572_vm1, %v554_v26 }
  0x83   : > { %1801 = vmatprep.mubr.msk.f32.mxu1 %vm2142_vm0, %v2143_v2 }
  0xf7   : > { %v736_v27 = vpop.permute.xlu0 %735 }
  0xf8   : > { %v743_v28 = vmul.f32 %v736_v27, %v553_v12 }
  0xf9   : > { %v730_v31 = vpop.permute.xlu1 %729 }
  0xfa   : > { %1794 = vmatprep.mubr.msk.f32.mxu0 %vm572_vm1, %v743_v28  ;;  %v732_v32 = vmul.f32 %v730_v31, %v552_v17 }
  0xfb   : > { %v741_v29 = vpop.permute.xlu0 %740 }
  0xfc   : > { %v744_v30 = vmul.f32 %v741_v29, %v554_v26  ;;  %1804 = vmatprep.subr.msk.mxu0 %vm572_vm1, %v732_v32 }
  0xfe   : > { %1795 = vmatmul.mubr.msk.f32.vlgmr.msra.gmra.mrb[2].mxu0 %vm572_vm1, %v744_v30 }
  0xff   : > { %1805 = vmatpush3.xpose.msk.msra.mxu0 %vm572_vm1, %v732_v32 }
 0x14f   : > { %v642_v33 = vpop.f32.mrb[0].mxu0 }
 0x150   : > { %v1774_v34 = vpop.f32.mrb[1].mxu0  ;;  %1816 = vmatprep.subr.mxu0 %v642_v33 }
 0x155   : > { %v1785_v35 = vpop.f32.mrb[0].mxu1 }
 0x156   : > { %v718_v39 = vpop.f32.mrb[1].mxu1 }
 0x157   : > { %v1848_v40 = vpack.c.bf16 %v1785_v35, %v718_v39 }
 0x1d1   : > { %v1796_v36 = vpop.f32.mrb[2].mxu0 }
 0x1d2   : > { %v817_v37 = vpop.f32.mrb[3].mxu0 }
 0x1d3   : > { %v1844_v38 = vpack.c.bf16 %v1796_v36, %v817_v37  ;;  %1806 = vmatprep.mubr.msk.f32.mxu0 %vm572_vm1, %v817_v37 }
 0x1d4   : > { %1807 = vmatmul.mubr.msk.f32.vlgmr.msra.gmra.mrb[4].mxu0 %vm572_vm1, %v1796_v36 }
 0x1d5   : > { %1817 = vmatpush3.msra.mxu0 %v642_v33  ;;  %1846 = vmatpush3.bf16.xpose.msk.msra.mxu1 %vm1845_vm2, %v1844_v38 }
 0x1d6   : > { %1847 = vmatprep.subr.bf16.mxu1 %v2141_v1  ;;  %v1206_v1 = vunpack.c.l.s4 %v2144_v0 }
 0x1d8   : > { %v1207_v3 = vunpack.c.0.s8 %v1206_v1 }
 0x1dc   : > { %1802 = vmatmul.mubr.msk.f32.vlgmr.msra.gmra.mrb[2].mxu1 %vm572_vm1, %v732_v32 }
 0x1dd   : > { %1813 = vmatprep.mubr.msk.f32.mxu1 %vm2142_vm0, %v2143_v2  ;;  %1849 = vmatpush3.bf16.msra.mxu1 %v1848_v40  ;;  %v2459_v2 = vshrl.u32 %v1169_v63, 7 }
 0x1df   : > { %v1171_v4 = vsub.s32 0, %v2459_v2  ;;  %v1175_v5 = vsub.s32 1, %v2459_v2  ;;  %v1179_v6 = vsub.s32 2, %v2459_v2  ;;  %v1183_v7 = vsub.s32 3, %v2459_v2 }
 0x1e0   : > { %v1187_v8 = vsub.s32 4, %v2459_v2  ;;  %v1191_v9 = vsub.s32 5, %v2459_v2  ;;  %v1195_v10 = vsub.s32 6, %v2459_v2  ;;  %v1199_v11 = vsub.s32 7, %v2459_v2 }
 0x1e1   : > { %v2470_v13 = vsub.s32 %v1207_v3, %v2459_v2 }
 0x2a7   : > { %v1808_v41 = vpop.f32.mrb[4].mxu0 }
 0x2a8   : > { %v971_v42 = vpop.f32.mrb[5].mxu0 }
 0x2a9   : > { %1818 = vmatprep.mubr.msk.f32.mxu0 %vm1056_vm3, %v971_v42 }
 0x2aa   : > { %1819 = vmatmul.mubr.msk.f32.vlgmr.msra.gmra.mrb[6].mxu0 %vm1056_vm3, %v1808_v41 }
 0x2af   : > { %v901_v43 = vpop.f32.mrb[2].mxu1 }
 0x2b0   : > { %v1803_v44 = vpop.f32.mrb[3].mxu1  ;;  %1814 = vmatmul.mubr.msk.f32.vlgmr.msra.gmra.mrb[4].mxu1 %vm980_vm4, %v901_v43 }
 0x37d   : > { %v1820_v45 = vpop.f32.mrb[6].mxu0 }
 0x37e   : > { %v1139_v46 = vadd.f32 %v1820_v45, %v1785_v35  ;;  %v1129_v47 = vpop.f32.mrb[7].mxu0 }
 0x37f   : > { %v1138_v48 = vadd.f32 %v1129_v47, %v718_v39 }
 0x380   : > { %1931 = vtanh.f32 %v1139_v46 }
 0x381   : > { %1933 = vtanh.f32 %v1138_v48 }
 0x383   : > { %v1050_v49 = vpop.f32.mrb[4].mxu1 }
 0x384   : > { %v1054_v50 = vadd.f32 %v1050_v49, %v642_v33  ;;  %v1815_v51 = vpop.f32.mrb[5].mxu1 }
 0x386   : > { %1935 = vtanh.f32 %v1054_v50 }
 0x38a   : > { %v1932_v53 = vpop.eup %1931 }
 0x38b   : > { %v1934_v54 = vpop.eup %1933  ;;  %v1159_v55 = vmul.f32 %v1932_v53, %v1728_v52 }
 0x38c   : > { %v1158_v56 = vmul.f32 %v1934_v54, %v1728_v52 }
 0x38d   : > { %v1163_v57 = vsel %vm572_vm1, %v1159_v55, 0.0 }
 0x38e   : > { %1164 = vadd.xlane.f32.xlu0 %v1163_v57  ;;  %v1160_v58 = vsel %vm572_vm1, %v1158_v56, 0.0 }
 0x38f   : > { %1161 = vadd.xlane.f32.xlu1 %v1160_v58 }
 0x390   : > { %v1936_v60 = vpop.eup %1935 }
 0x391   : > { %v1148_v61 = vmul.f32 %v1936_v60, %v1727_v59 }
 0x393   : > { %v1149_v62 = vsel %vm572_vm1, %v1148_v61, 0.0 }
 0x394   : > { %1150 = vadd.xlane.f32.xlu0 %v1149_v62 }
 0x41b   : > { %v1165_v12 = vpop.xlane.xlu0 %1164 }
 0x41c   : > { %v1162_v14 = vpop.xlane.xlu1 %1161  ;;  %v1314_v15 = vrot.slane %v1165_v12, %v1171_v4  ;;  %v1318_v16 = vrot.slane %v1165_v12, %v1175_v5  ;;  %v1322_v17 = vrot.slane %v1165_v12, %v1179_v6  ;;  %v1326_v18 = vrot.slane %v1165_v12, %v1183_v7 }
 0x41d   : > { %v1330_v19 = vrot.slane %v1165_v12, %v1187_v8  ;;  %v1334_v20 = vrot.slane %v1165_v12, %v1191_v9  ;;  %v1338_v21 = vrot.slane %v1165_v12, %v1195_v10  ;;  %v1342_v22 = vrot.slane %v1165_v12, %v1199_v11 }
 0x41e   : > { %v1392_v23 = vcombine.low %v1314_v15, %v1318_v16  ;;  %v1393_v24 = vcombine.low %v1322_v17, %v1326_v18  ;;  %v1282_v25 = vrot.slane %v1162_v14, %v1171_v4  ;;  %v1286_v26 = vrot.slane %v1162_v14, %v1175_v5 }
 0x41f   : > { %v1394_v27 = vcombine.low %v1330_v19, %v1334_v20  ;;  %v1395_v28 = vcombine.low %v1338_v21, %v1342_v22  ;;  %v1290_v29 = vrot.slane %v1162_v14, %v1179_v6  ;;  %v1294_v30 = vrot.slane %v1162_v14, %v1183_v7 }
 0x420   : > { %v1402_v31 = vrot.slane %v1392_v23, %v2470_v13  ;;  %v1409_v32 = vrot.slane %v1393_v24, %v2470_v13  ;;  %v1298_v33 = vrot.slane %v1162_v14, %v1187_v8  ;;  %v1302_v34 = vrot.slane %v1162_v14, %v1191_v9 }
 0x421   : > { %v1151_v35 = vpop.xlane.xlu0 %1150  ;;  %v1416_v36 = vrot.slane %v1394_v27, %v2470_v13  ;;  %v1423_v37 = vrot.slane %v1395_v28, %v2470_v13  ;;  %v1306_v38 = vrot.slane %v1162_v14, %v1195_v10  ;;  %v1310_v39 = vrot.slane %v1162_v14, %v1199_v11 }
 0x422   : > { %v1424_v40 = vcombine.low %v1402_v31, %v1409_v32  ;;  %v1343_v41 = vcombine.low %v1282_v25, %v1286_v26  ;;  %v1344_v42 = vcombine.low %v1290_v29, %v1294_v30  ;;  %v1345_v43 = vcombine.low %v1298_v33, %v1302_v34  ;;  %v1275_v26 = vld [vmem:[%s551_s14] sm:$0x1]  ;;  %s2523_s14 = sshll.u32 %s2621_s12, 4  ;;  %s2556_s14 = int_to_ptr.vmem [resolvable:$true] %s2523_s14 }
 0x423   : > { %v1425_v44 = vcombine.low %v1416_v36, %v1423_v37  ;;  %v1346_v45 = vcombine.low %v1306_v38, %v1310_v39  ;;  %v1172_v46 = vrot.slane %v1151_v35, %v1171_v4  ;;  %v1176_v47 = vrot.slane %v1151_v35, %v1175_v5  ;;  %v1166_v30 = vld [vmem:[%s548_s28] sm:$0x1]  ;;  %s2145_s28 = smov [#allocation9]  }
 0x424   : > { %v1432_v48 = vrot.slane %v1424_v40, %v2470_v13  ;;  %v1353_v49 = vrot.slane %v1343_v41, %v2470_v13  ;;  %v1360_v50 = vrot.slane %v1344_v42, %v2470_v13  ;;  %v1367_v51 = vrot.slane %v1345_v43, %v2470_v13  ;;  %s2035_s30 = sshll.u32 %s2145_s28, 4  ;;  %s2036_s30 = int_to_ptr.vmem [resolvable:$false] %s2035_s30 }
 0x425   : > { %v1439_v52 = vrot.slane %v1425_v44, %v2470_v13  ;;  %v1374_v53 = vrot.slane %v1346_v45, %v2470_v13  ;;  %v1180_v54 = vrot.slane %v1151_v35, %v1179_v6  ;;  %v1184_v55 = vrot.slane %v1151_v35, %v1183_v7  ;;  %s2037_s15 = scalar_lea.vmem %s2036_s30, 32  ;;  %p2038_p9 = scmp.lt.s32.totalorder %s2518_s26, %s2036_s30 }
 0x426   : > { %v1375_v56 = vcombine.low %v1353_v49, %v1360_v50  ;;  %v1188_v57 = vrot.slane %v1151_v35, %v1187_v8  ;;  %v1192_v58 = vrot.slane %v1151_v35, %v1191_v9  ;;  %v1196_v59 = vrot.slane %v1151_v35, %v1195_v10  ;;  %p2039_p12 = scmp.lt.s32.totalorder %s2037_s15, %s2031_s17 }
 0x427   : > { %v1440_v60 = vcombine.low %v1432_v48, %v1439_v52  ;;  %v1376_v61 = vcombine.low %v1367_v51, %v1374_v53  ;;  %v1200_v62 = vrot.slane %v1151_v35, %v1199_v11  ;;  %v1201_v0 = vcombine.low %v1172_v46, %v1176_v47 }
 0x428   : > { %v1383_v1 = vrot.slane %v1375_v56, %v2470_v13  ;;  %v1202_v3 = vcombine.low %v1180_v54, %v1184_v55  ;;  %v1203_v4 = vcombine.low %v1188_v57, %v1192_v58  ;;  %v1254_v18 = vand.u32 127, %v1169_v63  ;;  %p2040_p2 = por %p2039_p12, %p2038_p9 }
 0x429   : > { %1445 = vperm.xlu0 %1929, %v1440_v60   ;;  %v1390_v5 = vrot.slane %v1376_v61, %v2470_v13  ;;  %v1204_v12 = vcombine.low %v1196_v59, %v1200_v62  ;;  %v1211_v14 = vrot.slane %v1201_v0, %v2470_v13  ;;  %vm1276_vm6 = vcmp.lt.f32.partialorder %v1275_v26, 0.5 }
 0x42a   : > { %v1218_v6 = vrot.slane %v1202_v3, %v2470_v13  ;;  %v1225_v7 = vrot.slane %v1203_v4, %v2470_v13  ;;  %v1451_v19 = vadd.s32 4294967288, %v1254_v18  ;;  %v1257_v22 = vsub.s32 %v1254_v18, %v2459_v2  ;;  %p2041_p13 = pnand %p2040_p2, %p2034_p7 }
 0x42b   : > { %v1391_v8 = vcombine.low %v1383_v1, %v1390_v5  ;;  %v1232_v9 = vrot.slane %v1204_v12, %v2470_v13  ;;  %vm1167_vm8 = vcmp.lt.f32.partialorder %v1166_v30, 0.5 }
 0x42c   : > { %v1233_v10 = vcombine.low %v1211_v14, %v1218_v6  ;;  %v1454_v20 = vsub.s32 %v1451_v19, %v2459_v2 }
 0x42d   : > { %1442 = vperm.xlu1 %1930, %v1391_v8   ;;  %v1234_v11 = vcombine.low %v1225_v7, %v1232_v9 }
 0x42e   : > { %v1241_v15 = vrot.slane %v1233_v10, %v2470_v13 }
 0x42f   : > { %v1248_v16 = vrot.slane %v1234_v11, %v2470_v13 }
 0x431   : > { %v1249_v17 = vcombine.low %v1241_v15, %v1248_v16 }
 0x433   : > { %1251 = vperm.xlu1 %1930, %v1249_v17  }
 0x4a8   : > { %v1446_v21 = vpop.permute.xlu0 %1445 }
 0x4a9   : > { %v1455_v23 = vrot.slane %v1446_v21, %v1454_v20 }
 0x4ac   : > { %v1443_v24 = vpop.permute.xlu1 %1442 }
 0x4ad   : > { %v1450_v25 = vrot.slane %v1443_v24, %v1257_v22 }
 0x4af   : > { %v1457_v27 = vsel %vm1456_vm5, %v1455_v23, %v1450_v25 }
 0x4b0   : > { %v1464_v28 = vrot.slane %v1457_v27, %v2470_v13 }
 0x4b2   : > { %v1252_v63 = vpop.permute.xlu1 %1251  ;;  %v1471_v2 = vrot.slane %v1464_v28, %v2470_v13 }
 0x4b3   : > { %v1258_v29 = vrot.slane %v1252_v63, %v1257_v22 }
 0x4b4   : > { %v1473_v31 = vsel %vm1276_vm6, -inf, %v1471_v2 }
 0x4b5   : > { %v1265_v32 = vrot.slane %v1258_v29, %v2470_v13  ;;  %v1488_v33 = vsel %vm1487_vm7, %v1473_v31, -inf }
 0x4b6   : > { %1489 = vmax.xlane.f32.xlu0 %v1488_v33 }
 0x4b7   : > { %v1272_v34 = vrot.slane %v1265_v32, %v2470_v13 }
 0x4b9   : > { %v1274_v35 = vsel %vm1167_vm8, -inf, %v1272_v34 }
 0x4ba   : > { %v1475_v36 = vsel %vm1474_vm9, %v1274_v35, -inf }
 0x4bb   : > { %1476 = vmax.xlane.f32.xlu1 %v1475_v36 }
 0x543   : > { %v1490_v37 = vpop.xlane.xlu0 %1489 }
 0x544   : > { %v1491_v38 = vsub.f32 %v1473_v31, %v1490_v37 }
 0x546   : > { %v1492_v39 = vmul.f32 1.442695, %v1491_v38 }
 0x548   : > { %1937 = vpow2.f32 %v1492_v39  ;;  %v1477_v40 = vpop.xlane.xlu1 %1476 }
 0x549   : > { %v1478_v41 = vsub.f32 %v1274_v35, %v1477_v40 }
 0x54b   : > { %v1479_v42 = vmul.f32 1.442695, %v1478_v41 }
 0x54d   : > { %1939 = vpow2.f32 %v1479_v42 }
 0x552   : > { %v1938_v43 = vpop.eup %1937 }
 0x553   : > { %v1494_v44 = vsel %vm1487_vm7, %v1938_v43, 0.0 }
 0x554   : > { %1495 = vadd.xlane.f32.xlu1 %v1494_v44 }
 0x557   : > { %v1940_v13 = vpop.eup %1939 }
 0x558   : > { %v1481_v45 = vsel %vm1474_vm9, %v1940_v13, 0.0 }
 0x559   : > { %1482 = vadd.xlane.f32.xlu0 %v1481_v45 }
 0x5e1   : > { %v1496_v46 = vpop.xlane.xlu1 %1495 }
 0x5e2   : > { %1941 = vrcp.f32 %v1496_v46 }
 0x5e6   : > { %v1483_v47 = vpop.xlane.xlu0 %1482 }
 0x5e7   : > { %1943 = vrcp.f32 %v1483_v47 }
 0x5ec   : > { %v1942_v48 = vpop.eup %1941 }
 0x5ed   : > { %v1498_v49 = vmul.f32 %v1942_v48, %v1938_v43 }
 0x5ef   : > { %1499 = vst.msk [vmem:[%s531_s13] sm:$0x1] %vm1487_vm7, %v1498_v49 }
 0x5f0   : > { %2044 = shalt.err (!%p2041_p13)
}
 0x5f1   : > { %s2045_s13 = scalar_lea.hbm %s2516_s11, 16  ;;  %s2049_s28 = scalar_lea.hbm %s2639_s27, 32 }
 0x5f2   : > { %p2046_p6 = scmp.ne.s32.totalorder %s2516_s11, %s2045_s13  ;;  %p2050_p5 = scmp.lt.u32.totalorder %s2516_s11, %s2639_s27 }
 0x5f3   : > { %p2051_p8 = scmp.lt.u32.totalorder %s2049_s28, %s2045_s13  ;;  %p2053_p0 = scmp.lt.u32.totalorder %s2045_s13, %s2516_s11 }
 0x5f4   : > { %p2047_p10 = pnand %p2046_p6, %p2640_p1 }
 0x5f5   : > { %p2052_p11 = por %p2051_p8, %p2050_p5 }
 0x5f6   : > { %p2048_p4 = pneg %p2047_p10 }
 0x5f7   : > { %p2054_p3 = por %p2053_p0, %p2052_p11 }
 0x5f9   : > { %p2055_p7 = pnand %p2054_p3, %p2048_p4 }
 0x5fb   : > { %2058 = shalt.err (!%p2055_p7)
}
 0x5fc   : > { %1861 = dma.vmem_to_hbm [thread:$0]  (%p2640_p1), %s2518_s26, 16, %s2516_s11, %s1505_s16   ;;  %v1944_v50 = vpop.eup %1943 }
 0x5fd   : > { %v1485_v51 = vmul.f32 %v1944_v50, %v1940_v13  ;;  %s2641_s0 = sshll.u32 %s2233_s25, 4  ;;  %s2642_s17 = sld [smem:[#allocation18_spill]] }
 0x5fe   : > { %s2643_s13 = scalar_lea.vmem [#allocation8], %s2381_s18  ;;  %s1501_s28 = scalar_lea.sflag [#allocation4], %s2381_s18 }
 0x5ff   : > { %1486 = vst.msk [vmem:[%s2643_s13] sm:$0x1] %vm1474_vm9, %v1485_v51  ;;  %s2059_s30 = scalar_lea.vmem %s2556_s14, 16  ;;  %s2146_s25 = smov [#allocation8]  }
 0x600   : > { %p2060_p9 = scmp.ne.s32.totalorder %s2556_s14, %s2059_s30  ;;  %s2063_s26 = sshll.u32 %s2146_s25, 4  ;;  %s2064_s26 = int_to_ptr.vmem [resolvable:$false] %s2063_s26 }
 0x601   : > { %s2065_s11 = scalar_lea.vmem %s2064_s26, 32  ;;  %p2066_p13 = scmp.lt.s32.totalorder %s2556_s14, %s2064_s26 }
 0x602   : > { %p2061_p12 = pnand %p2060_p9, %p2640_p1  ;;  %p2067_p6 = scmp.lt.s32.totalorder %s2065_s11, %s2059_s30 }
 0x603   : > { %s2553_s15 = scalar_lea.hbm %s2642_s17, %s2641_s0 }
 0x604   : > { %p2062_p2 = pneg %p2061_p12  ;;  %p2068_p10 = por %p2067_p6, %p2066_p13 }
 0x606   : > { %p2069_p4 = pnand %p2068_p10, %p2062_p2 }
 0x608   : > { %2072 = shalt.err (!%p2069_p4)
}
 0x609   : > { %s2073_s18 = scalar_lea.hbm %s2553_s15, 16  ;;  %s2077_s29 = scalar_lea.hbm %s2642_s17, 32 }
 0x60a   : > { %p2074_p5 = scmp.ne.s32.totalorder %s2553_s15, %s2073_s18  ;;  %p2078_p0 = scmp.lt.u32.totalorder %s2553_s15, %s2642_s17 }
 0x60b   : > { %p2079_p3 = scmp.lt.u32.totalorder %s2077_s29, %s2073_s18  ;;  %p2081_p9 = scmp.lt.u32.totalorder %s2073_s18, %s2553_s15 }
 0x60c   : > { %p2075_p8 = pnand %p2074_p5, %p2640_p1 }
 0x60d   : > { %p2080_p7 = por %p2079_p3, %p2078_p0 }
 0x60e   : > { %p2076_p11 = pneg %p2075_p8 }
 0x60f   : > { %p2082_p12 = por %p2081_p9, %p2080_p7 }
 0x611   : > { %p2083_p2 = pnand %p2082_p12, %p2076_p11 }
 0x613   : > { %2086 = shalt.err (!%p2083_p2)
}
 0x614   : > { %1860 = dma.vmem_to_hbm [thread:$0]  (%p2640_p1), %s2556_s14, 16, %s2553_s15, %s1501_s28  }
 0x615 PF: > { %s2644_s30 = sld [smem:[#allocation15_spill]]  ;;  %s2645_s25 = sld [smem:[#allocation16_spill]] }
 0x616   : > { %p2647_p6 = scmp.ge.s32.totalorder %s2133_s24, 2 }
 0x61b   : > { %s1542_s26 = sand.u32 1, %s2644_s30   ;;  %p2646_p13 = scmp.ne.s32.totalorder %s2645_s25, 0 }
 0x61c   : > { %s1543_s11 = scalar_lea.sflag [#allocation4], %s1542_s26 }
 0x61d   : > { %p1876_p10 = pnand %p2647_p6, %p2646_p13 }
 0x61f   : > { %2112 = dma.done.wait (!%p1876_p10), %s1543_s11, 16  }
 0x620   : > { %2114 = vsyncadd (!%p1876_p10), %s1543_s11, 4294967280  ;;  %s1551_s18 = scalar_lea.sflag [#allocation10], %s1542_s26 }
 0x621   : > { %2116 = dma.done.wait (!%p1876_p10), %s1551_s18, 16  }
 0x622   : > { %2118 = vsyncadd (!%p1876_p10), %s1551_s18, 4294967280  ;;  %s2648_s19 = smov %s2322_s21  ;;  %p30_p1 = scmp.ge.s32.totalorder %s2322_s21, 4  }
 0x623   : > { %s2649_s21 = smov %s2125_s22  ;;  %s2650_s22 = smov %s2129_s23 }
 0x624   : > { %s2651_s23 = smov %s2338_s20  ;;  %s2652_s24 = smov %s2648_s19 }
 0x625   :  { %32 = sbr.rel (!%p30_p1) target bundleno = 12 (0xc), region = 149 }
 0x62c   :  { %1555 = vsyncpa [#allocation3], 1 }
 0x62d   :  { %1557 = vsyncpa [#allocation3 + $0x1], 1 }
 0x62e   :  { %1558 = vsyncpa [#allocation6], 1 }
 0x62f   :  { %1559 = vsyncpa [#allocation4], 1 }
 0x630   :  { %1561 = vsyncpa [#allocation4 + $0x1], 1 }
 0x631   :  { %1562 = vsyncpa [#allocation10], 1 }
 0x632   :  { %1564 = vsyncpa [#allocation10 + $0x1], 1 }

</bundles_post_ra>
